<compile_context>
chip_gen: v7x
topology: tpu7x:2x2x1
jax: 0.10.0
libtpu: 0.0.40
codegen_flags: <defaults>
</compile_context>

<pallas_src>
import numpy as np
import jax
import jax.numpy as jnp
from jax.experimental import pallas as pl
from jax.experimental.pallas import tpu as pltpu

INPUT_SIZE = 22
NUM_CLASSES = 10
C1, C2, HID = 16, 32, 128
L1 = INPUT_SIZE            # 22
P1 = L1 // 2               # 11
L2 = P1                    # 11
P2 = L2 // 2               # 5   -> flatten dim = 32 * 5 = 160
K1 = 256                   # lane-aligned width of one conv1 pool half (>= P1*C1 = 176)
K2 = 256                   # lane-aligned width of one conv2 pool half (>= P2*C2 = 160)
OUT_PAD = 128              # lane-dense output width (>= NUM_CLASSES)


# ---------------------------------------------------------------------------
# Kernel: whole forward pass for one batch tile.  4 MXU matmuls, no loops.
# ---------------------------------------------------------------------------
def cnn_kernel(x_ref, w1_ref, b1_ref, w2_ref, b2_ref,
               wf1_ref, bf1_ref, wf2_ref, bf2_ref, out_ref):
    """
    x_ref  : (bt, 22)    bf16  raw input (Cin == 1, channel dim dropped)
    w1_ref : (22, 512)   bf16  conv1 Toeplitz; [even-pool half | odd-pool half], 256 lanes each
    b1_ref : (1, 256)    f32   conv1 bias tiled over pooled positions (zero-padded tail)
    w2_ref : (256, 512)  bf16  conv2 Toeplitz, same even/odd layout (zero-padded rows 176..255)
    b2_ref : (1, 256)    f32
    wf1_ref: (256, 128)  bf16  fc1 weight, torch flatten order folded in, zero-padded rows
    bf1_ref: (1, 128)    f32
    wf2_ref: (128, 128)  bf16  fc2 weight zero-padded to a lane-dense 128-wide output
    bf2_ref: (1, 128)    f32
    out_ref: (bt, 128)   f32   real logits live in [:, :10]
    """
    f32, bf16 = jnp.float32, jnp.bfloat16
    x = x_ref[...]                                                    # (bt, 22) bf16

    # conv1 (+bias) -> relu -> maxpool; even/odd pooled selection folded into one RHS.
    h1 = jnp.dot(x, w1_ref[...], preferred_element_type=f32)         # (bt, 512)
    p1 = jnp.maximum(jnp.maximum(h1[:, :K1], h1[:, K1:]) + b1_ref[...], 0.0)   # (bt, 256)

    # conv2 (+bias) -> relu -> maxpool (floor mode drops position 10).
    h2 = jnp.dot(p1.astype(bf16), w2_ref[...], preferred_element_type=f32)     # (bt, 512)
    p2 = jnp.maximum(jnp.maximum(h2[:, :K2], h2[:, K2:]) + b2_ref[...], 0.0)   # (bt, 256)

    # fc1 -> relu  (PyTorch channel-major flatten folded into wf1).
    h3 = jnp.dot(p2.astype(bf16), wf1_ref[...], preferred_element_type=f32) + bf1_ref[...]
    h3 = jnp.maximum(h3, 0.0)                                         # (bt, 128)

    # fc2 -> single lane-dense batched store.
    logits = jnp.dot(h3.astype(bf16), wf2_ref[...], preferred_element_type=f32) + bf2_ref[...]
    out_ref[...] = logits.astype(out_ref.dtype)                       # (bt, 128)


# ---------------------------------------------------------------------------
# Wrapper
# ---------------------------------------------------------------------------
def _cdiv(a, b):
    return (a + b - 1) // b


def _round_up(a, m):
    return _cdiv(a, m) * m


def cnn_forward(x_ncl, kp, b_tile=2048):
    """x_ncl: (B, 1, 22) f32 (PyTorch NCL layout).  Returns (B, 10) f32 logits.

    b_tile=2048 keeps per-step live intermediates ~10 MB (fits the default
    scoped VMEM on v5e/v6e/v7x).  Cap near 4096 on v7x (64 MiB physical VMEM)
    or raise pltpu.CompilerParams(vmem_limit_bytes=...) on v5e/v6e if pushing
    larger tiles.
    """
    B = x_ncl.shape[0]
    x = x_ncl.reshape(B, INPUT_SIZE).astype(jnp.bfloat16)             # Cin == 1

    b_tile = max(8, _round_up(b_tile, 8))
    n_blk = max(1, _cdiv(B, b_tile))
    if n_blk == 1 and B >= 1024:
        n_blk = 2              # v7x megacore: keep both TensorCores busy
    bt = _round_up(_cdiv(B, n_blk), 8)        # sublane-aligned batch tile
    Bp = n_blk * bt
    if Bp != B:
        x = jnp.pad(x, ((0, Bp - B), (0, 0)))

    w_names = ["w1", "b1", "w2", "b2", "wf1", "bf1", "wf2", "bf2"]

    in_specs = [pl.BlockSpec((bt, INPUT_SIZE), lambda i: (i, 0))]
    # Weights / biases: single (only) block, resident every grid step.
    in_specs += [pl.BlockSpec(kp[n].shape, lambda i: (0, 0)) for n in w_names]

    out = pl.pallas_call(
        cnn_kernel,
        out_shape=jax.ShapeDtypeStruct((Bp, OUT_PAD), jnp.float32),
        grid_spec=pltpu.PrefetchScalarGridSpec(
            num_scalar_prefetch=0,
            grid=(n_blk,),
            in_specs=in_specs,
            out_specs=pl.BlockSpec((bt, OUT_PAD), lambda i: (i, 0)),
        ),
        compiler_params=pltpu.CompilerParams(
            dimension_semantics=("parallel",)),
    )(x, *[kp[n] for n in w_names])
    return out[:B, :NUM_CLASSES]


# ---------------------------------------------------------------------------
# Host-side weight preparation: conv -> Toeplitz, pool fold, flatten fold,
# even/odd merge with 256-lane halves, lane-dense fc2 padding.
# ---------------------------------------------------------------------------
def prepare_kernel_params(tp):
    w1 = np.asarray(tp["conv1_w"], np.float32)   # (16, 1, 3)  torch conv1.weight
    b1 = np.asarray(tp["conv1_b"], np.float32)   # (16,)
    w2 = np.asarray(tp["conv2_w"], np.float32)   # (32, 16, 3)
    b2 = np.asarray(tp["conv2_b"], np.float32)   # (32,)
    wf1 = np.asarray(tp["fc1_w"], np.float32)    # (128, 160)
    bf1 = np.asarray(tp["fc1_b"], np.float32)    # (128,)
    wf2 = np.asarray(tp["fc2_w"], np.float32)    # (10, 128)
    bf2 = np.asarray(tp["fc2_b"], np.float32)    # (10,)

    # conv1 as dense Toeplitz: input pos p -> output (pos l, channel co).
    # Zero-pad rows are simply omitted (pad contributes nothing).
    T1 = np.zeros((L1, L1, C1), np.float32)                  # [p_in, l_out, c_out]
    for l in range(L1):
        for k in range(3):
            p = l + k - 1
            if 0 <= p < L1:
                T1[p, l, :] = w1[:, 0, k]
    w1e = T1[:, 0:2 * P1:2, :].reshape(L1, P1 * C1)          # even pooled positions (22, 176)
    w1o = T1[:, 1:2 * P1:2, :].reshape(L1, P1 * C1)          # odd pooled positions
    w1m = np.zeros((L1, 2 * K1), np.float32)                 # merged RHS, lane-aligned halves
    w1m[:, :P1 * C1] = w1e
    w1m[:, K1:K1 + P1 * C1] = w1o
    b1p = np.zeros((1, K1), np.float32)
    b1p[0, :P1 * C1] = np.tile(b1, P1)

    # conv2 Toeplitz: input (l_in, c_in) -> output (l_out, c_out).
    T2 = np.zeros((L2, C1, L2, C2), np.float32)              # [l_in, c_in, l_out, c_out]
    for l in range(L2):
        for k in range(3):
            li = l + k - 1
            if 0 <= li < L2:
                T2[li, :, l, :] = w2[:, :, k].T              # (c_in, c_out)
    T2 = T2.reshape(L2 * C1, L2, C2)
    w2e = T2[:, 0:2 * P2:2, :].reshape(L2 * C1, P2 * C2)     # positions 0,2,4,6,8 -> (176, 160)
    w2o = T2[:, 1:2 * P2:2, :].reshape(L2 * C1, P2 * C2)     # positions 1,3,5,7,9
    w2m = np.zeros((K1, 2 * K2), np.float32)                 # rows 176..255 zero (match p1 padding)
    w2m[:L2 * C1, :P2 * C2] = w2e
    w2m[:L2 * C1, K2:K2 + P2 * C2] = w2o
    b2p = np.zeros((1, K2), np.float32)
    b2p[0, :P2 * C2] = np.tile(b2, P2)

    # fc1: torch flatten index = c*P2 + l ; kernel flat index = l*C2 + c; zero-pad K to 256.
    wf1_k = wf1.reshape(HID, C2, P2).transpose(2, 1, 0).reshape(P2 * C2, HID)
    wf1_p = np.zeros((K2, HID), np.float32)
    wf1_p[:P2 * C2, :] = wf1_k

    # fc2: zero-pad N to a lane-dense 128-wide output (real logits in cols 0..9).
    wf2_p = np.zeros((HID, OUT_PAD), np.float32)
    wf2_p[:, :NUM_CLASSES] = wf2.T
    bf2_p = np.zeros((1, OUT_PAD), np.float32)
    bf2_p[0, :NUM_CLASSES] = bf2

    bf, f32 = jnp.bfloat16, jnp.float32
    return {
        "w1": jnp.asarray(w1m, bf), "b1": jnp.asarray(b1p, f32),
        "w2": jnp.asarray(w2m, bf), "b2": jnp.asarray(b2p, f32),
        "wf1": jnp.asarray(wf1_p, bf), "bf1": jnp.asarray(bf1[None, :], f32),
        "wf2": jnp.asarray(wf2_p, bf), "bf2": jnp.asarray(bf2_p, f32),
    }


# ---------------------------------------------------------------------------
# Pure-JAX reference matching the PyTorch module exactly (f32, torch layouts).
# ---------------------------------------------------------------------------
def reference_forward(x_ncl, tp):
    def conv(x, w, b):
        y = jax.lax.conv_general_dilated(
            x, w, window_strides=(1,), padding=[(1, 1)],
            dimension_numbers=("NCH", "OIH", "NCH"))
        return y + b.reshape(1, -1, 1)

    def pool(x):
        return jax.lax.reduce_window(x, -jnp.inf, jax.lax.max,
                                     (1, 1, 2), (1, 1, 2), "VALID")

    h = pool(jax.nn.relu(conv(x_ncl, tp["conv1_w"], tp["conv1_b"])))
    h = pool(jax.nn.relu(conv(h, tp["conv2_w"], tp["conv2_b"])))
    h = h.reshape(h.shape[0], -1)                            # torch channel-major flatten
    h = jax.nn.relu(h @ tp["fc1_w"].T + tp["fc1_b"])
    return h @ tp["fc2_w"].T + tp["fc2_b"]


def init_torch_params(key):
    ks = jax.random.split(key, 8)

    def u(k, shape, fan_in):
        bound = 1.0 / np.sqrt(fan_in)
        return jax.random.uniform(k, shape, jnp.float32, -bound, bound)

    return {
        "conv1_w": u(ks[0], (C1, 1, 3), 1 * 3),
        "conv1_b": u(ks[1], (C1,), 1 * 3),
        "conv2_w": u(ks[2], (C2, C1, 3), C1 * 3),
        "conv2_b": u(ks[3], (C2,), C1 * 3),
        "fc1_w":   u(ks[4], (HID, C2 * P2), C2 * P2),
        "fc1_b":   u(ks[5], (HID,), C2 * P2),
        "fc2_w":   u(ks[6], (NUM_CLASSES, HID), HID),
        "fc2_b":   u(ks[7], (NUM_CLASSES,), HID),
    }


if __name__ == "__main__":
    key = jax.random.PRNGKey(0)
    pkey, xkey = jax.random.split(key)
    torch_params = init_torch_params(pkey)
    kernel_params = prepare_kernel_params(torch_params)

    B = 4
    x = jax.random.normal(xkey, (B, 1, INPUT_SIZE), jnp.float32)  # torch NCL

    out = jax.block_until_ready(cnn_forward(x, kernel_params))
    ref = jax.block_until_ready(reference_forward(x, torch_params))

    assert out.shape == (B, NUM_CLASSES)
    np.testing.assert_allclose(np.asarray(out), np.asarray(ref), rtol=2e-2, atol=2e-2)
    print("KERNEL_OK")
</pallas_src>

<mosaic_0001>
module attributes {stable_mosaic.version = 11 : i64} {
  func.func @cnn_kernel(%arg0: i32, %arg1: memref<8x22xbf16, #tpu.memory_space<vmem>>, %arg2: memref<22x512xbf16, #tpu.memory_space<vmem>>, %arg3: memref<1x256xf32, #tpu.memory_space<vmem>>, %arg4: memref<256x512xbf16, #tpu.memory_space<vmem>>, %arg5: memref<1x256xf32, #tpu.memory_space<vmem>>, %arg6: memref<256x128xbf16, #tpu.memory_space<vmem>>, %arg7: memref<1x128xf32, #tpu.memory_space<vmem>>, %arg8: memref<128x128xbf16, #tpu.memory_space<vmem>>, %arg9: memref<1x128xf32, #tpu.memory_space<vmem>>, %arg10: memref<8x128xf32, #tpu.memory_space<vmem>>) attributes {dimension_semantics = [#tpu.dimension_semantics<parallel>], iteration_bounds = array<i64: 1>, scalar_prefetch = 0 : i64, scratch_operands = 0 : i64, tpu.core_type = #tpu.core_type<tc>, window_params = [{transform_indices = @transform_0, window_bounds = array<i64: 8, 22>}, {pipeline_mode = #tpu.pipeline_mode<synchronous>, transform_indices = @transform_1, window_bounds = array<i64: 22, 512>}, {pipeline_mode = #tpu.pipeline_mode<synchronous>, transform_indices = @transform_2, window_bounds = array<i64: 1, 256>}, {pipeline_mode = #tpu.pipeline_mode<synchronous>, transform_indices = @transform_3, window_bounds = array<i64: 256, 512>}, {pipeline_mode = #tpu.pipeline_mode<synchronous>, transform_indices = @transform_4, window_bounds = array<i64: 1, 256>}, {pipeline_mode = #tpu.pipeline_mode<synchronous>, transform_indices = @transform_5, window_bounds = array<i64: 256, 128>}, {pipeline_mode = #tpu.pipeline_mode<synchronous>, transform_indices = @transform_6, window_bounds = array<i64: 1, 128>}, {pipeline_mode = #tpu.pipeline_mode<synchronous>, transform_indices = @transform_7, window_bounds = array<i64: 128, 128>}, {pipeline_mode = #tpu.pipeline_mode<synchronous>, transform_indices = @transform_8, window_bounds = array<i64: 1, 128>}, {transform_indices = @transform_9, window_bounds = array<i64: 8, 128>}]} {
    %c0 = arith.constant 0 : index
    %c0_0 = arith.constant 0 : index
    %0 = vector.load %arg1[%c0, %c0_0] : memref<8x22xbf16, #tpu.memory_space<vmem>>, vector<8x22xbf16>
    %c0_1 = arith.constant 0 : index
    %c0_2 = arith.constant 0 : index
    %1 = vector.load %arg2[%c0_1, %c0_2] : memref<22x512xbf16, #tpu.memory_space<vmem>>, vector<22x512xbf16>
    %cst = arith.constant dense<0.000000e+00> : vector<8x512xf32>
    %2 = tpu.matmul %0, %1, %cst {dimension_numbers = #tpu.dot_dimension_numbers<[1], [0], [0], [1], [0, 0, 1, 1], [], []>} : vector<8x22xbf16>, vector<22x512xbf16>, vector<8x512xf32> -> vector<8x512xf32>
    %3 = vector.extract_strided_slice %2 {offsets = [0, 0], sizes = [8, 256], strides = [1, 1]} : vector<8x512xf32> to vector<8x256xf32>
    %4 = vector.extract_strided_slice %2 {offsets = [0, 256], sizes = [8, 256], strides = [1, 1]} : vector<8x512xf32> to vector<8x256xf32>
    %5 = arith.maximumf %3, %4 : vector<8x256xf32>
    %c0_3 = arith.constant 0 : index
    %c0_4 = arith.constant 0 : index
    %6 = vector.load %arg3[%c0_3, %c0_4] : memref<1x256xf32, #tpu.memory_space<vmem>>, vector<1x256xf32>
    %7 = vector.broadcast %6 : vector<1x256xf32> to vector<8x256xf32>
    %8 = arith.addf %5, %7 : vector<8x256xf32>
    %cst_5 = arith.constant 0.000000e+00 : f32
    %9 = vector.broadcast %cst_5 : f32 to vector<8x256xf32>
    %10 = arith.maximumf %8, %9 : vector<8x256xf32>
    %11 = arith.truncf %10 : vector<8x256xf32> to vector<8x256xbf16>
    %c0_6 = arith.constant 0 : index
    %c0_7 = arith.constant 0 : index
    %12 = vector.load %arg4[%c0_6, %c0_7] : memref<256x512xbf16, #tpu.memory_space<vmem>>, vector<256x512xbf16>
    %cst_8 = arith.constant dense<0.000000e+00> : vector<8x512xf32>
    %13 = tpu.matmul %11, %12, %cst_8 {dimension_numbers = #tpu.dot_dimension_numbers<[1], [0], [0], [1], [0, 0, 1, 1], [], []>} : vector<8x256xbf16>, vector<256x512xbf16>, vector<8x512xf32> -> vector<8x512xf32>
    %14 = vector.extract_strided_slice %13 {offsets = [0, 0], sizes = [8, 256], strides = [1, 1]} : vector<8x512xf32> to vector<8x256xf32>
    %15 = vector.extract_strided_slice %13 {offsets = [0, 256], sizes = [8, 256], strides = [1, 1]} : vector<8x512xf32> to vector<8x256xf32>
    %16 = arith.maximumf %14, %15 : vector<8x256xf32>
    %c0_9 = arith.constant 0 : index
    %c0_10 = arith.constant 0 : index
    %17 = vector.load %arg5[%c0_9, %c0_10] : memref<1x256xf32, #tpu.memory_space<vmem>>, vector<1x256xf32>
    %18 = vector.broadcast %17 : vector<1x256xf32> to vector<8x256xf32>
    %19 = arith.addf %16, %18 : vector<8x256xf32>
    %cst_11 = arith.constant 0.000000e+00 : f32
    %20 = vector.broadcast %cst_11 : f32 to vector<8x256xf32>
    %21 = arith.maximumf %19, %20 : vector<8x256xf32>
    %22 = arith.truncf %21 : vector<8x256xf32> to vector<8x256xbf16>
    %c0_12 = arith.constant 0 : index
    %c0_13 = arith.constant 0 : index
    %23 = vector.load %arg6[%c0_12, %c0_13] : memref<256x128xbf16, #tpu.memory_space<vmem>>, vector<256x128xbf16>
    %cst_14 = arith.constant dense<0.000000e+00> : vector<8x128xf32>
    %24 = tpu.matmul %22, %23, %cst_14 {dimension_numbers = #tpu.dot_dimension_numbers<[1], [0], [0], [1], [0, 0, 1, 1], [], []>} : vector<8x256xbf16>, vector<256x128xbf16>, vector<8x128xf32> -> vector<8x128xf32>
    %c0_15 = arith.constant 0 : index
    %c0_16 = arith.constant 0 : index
    %25 = vector.load %arg7[%c0_15, %c0_16] : memref<1x128xf32, #tpu.memory_space<vmem>>, vector<1x128xf32>
    %26 = vector.broadcast %25 : vector<1x128xf32> to vector<8x128xf32>
    %27 = arith.addf %24, %26 : vector<8x128xf32>
    %cst_17 = arith.constant 0.000000e+00 : f32
    %28 = vector.broadcast %cst_17 : f32 to vector<8x128xf32>
    %29 = arith.maximumf %27, %28 : vector<8x128xf32>
    %30 = arith.truncf %29 : vector<8x128xf32> to vector<8x128xbf16>
    %c0_18 = arith.constant 0 : index
    %c0_19 = arith.constant 0 : index
    %31 = vector.load %arg8[%c0_18, %c0_19] : memref<128x128xbf16, #tpu.memory_space<vmem>>, vector<128x128xbf16>
    %cst_20 = arith.constant dense<0.000000e+00> : vector<8x128xf32>
    %32 = tpu.matmul %30, %31, %cst_20 {dimension_numbers = #tpu.dot_dimension_numbers<[1], [0], [0], [1], [0, 0, 1, 1], [], []>} : vector<8x128xbf16>, vector<128x128xbf16>, vector<8x128xf32> -> vector<8x128xf32>
    %c0_21 = arith.constant 0 : index
    %c0_22 = arith.constant 0 : index
    %33 = vector.load %arg9[%c0_21, %c0_22] : memref<1x128xf32, #tpu.memory_space<vmem>>, vector<1x128xf32>
    %34 = vector.broadcast %33 : vector<1x128xf32> to vector<8x128xf32>
    %35 = arith.addf %32, %34 : vector<8x128xf32>
    %c0_23 = arith.constant 0 : index
    %c0_24 = arith.constant 0 : index
    %36 = vector.load %arg10[%c0_23, %c0_24] : memref<8x128xf32, #tpu.memory_space<vmem>>, vector<8x128xf32>
    tpu.vector_store %arg10[%c0_23, %c0_24], %35 {strides = array<i32>} : memref<8x128xf32, #tpu.memory_space<vmem>>, vector<8x128xf32>,
    return
  }
  func.func @transform_0(%arg0: i32) -> (i32, i32) {
    %c0_i32 = arith.constant 0 : i32
    %c0_i32_0 = arith.constant 0 : i32
    return %arg0, %c0_i32 : i32, i32
  }
  func.func @transform_1(%arg0: i32) -> (i32, i32) {
    %c0_i32 = arith.constant 0 : i32
    %c0_i32_0 = arith.constant 0 : i32
    %c0_i32_1 = arith.constant 0 : i32
    return %c0_i32, %c0_i32_0 : i32, i32
  }
  func.func @transform_2(%arg0: i32) -> (i32, i32) {
    %c0_i32 = arith.constant 0 : i32
    %c0_i32_0 = arith.constant 0 : i32
    %c0_i32_1 = arith.constant 0 : i32
    return %c0_i32, %c0_i32_0 : i32, i32
  }
  func.func @transform_3(%arg0: i32) -> (i32, i32) {
    %c0_i32 = arith.constant 0 : i32
    %c0_i32_0 = arith.constant 0 : i32
    %c0_i32_1 = arith.constant 0 : i32
    return %c0_i32, %c0_i32_0 : i32, i32
  }
  func.func @transform_4(%arg0: i32) -> (i32, i32) {
    %c0_i32 = arith.constant 0 : i32
    %c0_i32_0 = arith.constant 0 : i32
    %c0_i32_1 = arith.constant 0 : i32
    return %c0_i32, %c0_i32_0 : i32, i32
  }
  func.func @transform_5(%arg0: i32) -> (i32, i32) {
    %c0_i32 = arith.constant 0 : i32
    %c0_i32_0 = arith.constant 0 : i32
    %c0_i32_1 = arith.constant 0 : i32
    return %c0_i32, %c0_i32_0 : i32, i32
  }
  func.func @transform_6(%arg0: i32) -> (i32, i32) {
    %c0_i32 = arith.constant 0 : i32
    %c0_i32_0 = arith.constant 0 : i32
    %c0_i32_1 = arith.constant 0 : i32
    return %c0_i32, %c0_i32_0 : i32, i32
  }
  func.func @transform_7(%arg0: i32) -> (i32, i32) {
    %c0_i32 = arith.constant 0 : i32
    %c0_i32_0 = arith.constant 0 : i32
    %c0_i32_1 = arith.constant 0 : i32
    return %c0_i32, %c0_i32_0 : i32, i32
  }
  func.func @transform_8(%arg0: i32) -> (i32, i32) {
    %c0_i32 = arith.constant 0 : i32
    %c0_i32_0 = arith.constant 0 : i32
    %c0_i32_1 = arith.constant 0 : i32
    return %c0_i32, %c0_i32_0 : i32, i32
  }
  func.func @transform_9(%arg0: i32) -> (i32, i32) {
    %c0_i32 = arith.constant 0 : i32
    %c0_i32_0 = arith.constant 0 : i32
    return %arg0, %c0_i32 : i32, i32
  }
}

</mosaic_0001>

<bundles_post_ra>
// kernel: tpu_custom_call.1
= control target key start
LH: loop header
LB: loop body
LE: loop exit
PB: predicated region body
PF: predicated region fallthrough
CT: control target
= control target key end

     0   :  { %14 = vsyncpa [#allocation3], 0  ;;  %s1666_s0 = inlined_call_operand.hbm [shape: bf16[8,22], index: 0, kind: input, shape index: {}]   ;;  %s1667_s1 = inlined_call_operand.hbm [shape: bf16[22,512], index: 1, kind: input, shape index: {}]   ;;  %s1668_s2 = inlined_call_operand.vmem [shape: f32[1,256], index: 2, kind: input, shape index: {}]   ;;  %s1669_s3 = inlined_call_operand.hbm [shape: bf16[256,512], index: 3, kind: input, shape index: {}]   ;;  %s1670_s4 = inlined_call_operand.vmem [shape: f32[1,256], index: 4, kind: input, shape index: {}]   ;;  %s1671_s5 = inlined_call_operand.hbm [shape: bf16[256,128], index: 5, kind: input, shape index: {}]   ;;  %s1672_s6 = inlined_call_operand.vmem [shape: f32[1,128], index: 6, kind: input, shape index: {}]   ;;  %s1673_s7 = inlined_call_operand.hbm [shape: bf16[128,128], index: 7, kind: input, shape index: {}]   ;;  %s1674_s8 = inlined_call_operand.vmem [shape: f32[1,128], index: 8, kind: input, shape index: {}]   ;;  %s1675_s9 = inlined_call_operand.hbm [shape: f32[8,128], index: 9, kind: output, shape index: {}]  }
   0x1   :  { %15 = vsyncpa [#allocation6], 0 }
   0x2   :  { %16 = vsyncpa [#allocation9], 0 }
   0x3   :  { %17 = vsyncpa [#allocation4], 0  ;;  %s1484_s30 = smov [#allocation5]   ;;  %s1344_s13 = scalar_lea.hbm %s1667_s1, 768 }
   0x4   :  { %s33_s10 = sshll.u32 %s1484_s30, 4  ;;  %p1345_p0 = scmp.ne.s32.totalorder %s1667_s1, %s1344_s13  ;;  %s34_s10 = int_to_ptr.vmem [resolvable:$true] %s33_s10 }
   0x5   :  { %p1348_p1 = scmp.lt.u32.totalorder %s1344_s13, %s1667_s1 }
   0x7   :  { %p1350_p2 = pnand %p1348_p1, %p1345_p0 }
   0x9   :  { %1353 = shalt.err (!%p1350_p2)
}
   0xa   :  { %s1354_s18 = scalar_lea.vmem %s34_s10, 768  ;;  %p1359_p4 = scmp.lt.s32.totalorder %s34_s10, %s34_s10 }
   0xb   :  { %p1355_p3 = scmp.ne.s32.totalorder %s34_s10, %s1354_s18  ;;  %p1360_p5 = scmp.lt.s32.totalorder %s1354_s18, %s1354_s18 }
   0xd   :  { %p1361_p6 = por %p1360_p5, %p1359_p4 }
   0xf   :  { %p1362_p7 = pnand %p1361_p6, %p1355_p3 }
  0x11   :  { %1365 = shalt.err (!%p1362_p7)
}
  0x12   :  { %s1485_s19 = smov 256   ;;  %s1486_s20 = smov 16  }
  0x13   :  { %39 = dma.hbm_to_vmem [thread:$0]  %s1667_s1, 768, %s34_s10, [#allocation6], %s1485_s19, %s1485_s19, %s1486_s20  }
  0x14   :  { %s1487_s23 = smov [#allocation8]   ;;  %s1366_s27 = scalar_lea.hbm %s1671_s5, 2048 }
  0x15   :  { %s61_s24 = sshll.u32 %s1487_s23, 4  ;;  %p1367_p8 = scmp.ne.s32.totalorder %s1671_s5, %s1366_s27  ;;  %s62_s24 = int_to_ptr.vmem [resolvable:$true] %s61_s24 }
  0x16   :  { %p1370_p9 = scmp.lt.u32.totalorder %s1366_s27, %s1671_s5 }
  0x18   :  { %p1372_p10 = pnand %p1370_p9, %p1367_p8 }
  0x1a   :  { %1375 = shalt.err (!%p1372_p10)
}
  0x1b   :  { %s1376_s12 = scalar_lea.vmem %s62_s24, 2048  ;;  %p1381_p12 = scmp.lt.s32.totalorder %s62_s24, %s62_s24 }
  0x1c   :  { %p1377_p11 = scmp.ne.s32.totalorder %s62_s24, %s1376_s12  ;;  %p1382_p13 = scmp.lt.s32.totalorder %s1376_s12, %s1376_s12 }
  0x1e   :  { %p1383_p0 = por %p1382_p13, %p1381_p12 }
  0x20   :  { %p1384_p1 = pnand %p1383_p0, %p1377_p11 }
  0x22   :  { %1387 = shalt.err (!%p1384_p1)
}
  0x23   :  { %s1488_s1 = smov 64   ;;  %s1489_s10 = smov 4  }
  0x24   :  { %67 = dma.hbm_to_vmem [thread:$0]  %s1671_s5, 2048, %s62_s24, [#allocation9], %s1488_s1, %s1488_s1, %s1489_s10  }
  0x25   :  { %s1490_s15 = smov [#allocation2]   ;;  %s1491_s17 = smov [#allocation7]  }
  0x26   :  { %s24_s16 = sshll.u32 %s1490_s15, 4  ;;  %s47_s18 = sshll.u32 %s1491_s17, 4  ;;  %s25_s16 = int_to_ptr.vmem [resolvable:$true] %s24_s16  ;;  %s1577_s18 = int_to_ptr.vmem [resolvable:$true] %s47_s18 }
  0x27   :  { %s1388_s23 = scalar_lea.hbm %s1666_s0, 64 }
  0x28   :  { %p1389_p2 = scmp.ne.s32.totalorder %s1666_s0, %s1388_s23  ;;  %p1392_p3 = scmp.lt.u32.totalorder %s1388_s23, %s1666_s0 }
  0x2a   :  { %p1394_p4 = pnand %p1392_p3, %p1389_p2 }
  0x2c   :  { %1397 = shalt.err (!%p1394_p4)
}
  0x2d   :  { %s1398_s5 = scalar_lea.vmem %s25_s16, 64  ;;  %p1403_p6 = scmp.lt.s32.totalorder %s25_s16, %s25_s16 }
  0x2e   :  { %p1399_p5 = scmp.ne.s32.totalorder %s25_s16, %s1398_s5  ;;  %p1404_p7 = scmp.lt.s32.totalorder %s1398_s5, %s1398_s5 }
  0x30   :  { %p1405_p8 = por %p1404_p7, %p1403_p6 }
  0x32   :  { %p1406_p9 = pnand %p1405_p8, %p1399_p5 }
  0x34   :  { %1409 = shalt.err (!%p1406_p9)
}
  0x35   :  { %27 = dma.hbm_to_vmem [thread:$0]  %s1666_s0, 64, %s25_s16, [#allocation3]  }
  0x36   :  { %s1410_s12 = scalar_lea.hbm %s1669_s3, 8192 }
  0x37   :  { %p1411_p10 = scmp.ne.s32.totalorder %s1669_s3, %s1410_s12  ;;  %p1414_p11 = scmp.lt.u32.totalorder %s1410_s12, %s1669_s3 }
  0x39   :  { %p1416_p12 = pnand %p1414_p11, %p1411_p10 }
  0x3b   :  { %1419 = shalt.err (!%p1416_p12)
}
  0x3c   :  { %s1420_s21 = scalar_lea.vmem %s1577_s18, 8192  ;;  %p1425_p0 = scmp.lt.s32.totalorder %s1577_s18, %s1577_s18 }
  0x3d   :  { %p1421_p13 = scmp.ne.s32.totalorder %s1577_s18, %s1420_s21  ;;  %p1426_p1 = scmp.lt.s32.totalorder %s1420_s21, %s1420_s21 }
  0x3f   :  { %p1427_p2 = por %p1426_p1, %p1425_p0 }
  0x41   :  { %p1428_p3 = pnand %p1427_p2, %p1421_p13 }
  0x43   :  { %1431 = shalt.err (!%p1428_p3)
}
  0x44   :  { %53 = dma.hbm_to_vmem [thread:$0]  %s1669_s3, 8192, %s1577_s18, [#allocation6], %s1485_s19, %s1485_s19, %s1486_s20  }
  0x45   :  { %s1492_s22 = smov [#allocation10]   ;;  %s1432_s27 = scalar_lea.hbm %s1673_s7, 1024 }
  0x46   :  { %s75_s23 = sshll.u32 %s1492_s22, 4  ;;  %p1433_p4 = scmp.ne.s32.totalorder %s1673_s7, %s1432_s27  ;;  %s76_s23 = int_to_ptr.vmem [resolvable:$true] %s75_s23 }
  0x47   :  { %p1436_p5 = scmp.lt.u32.totalorder %s1432_s27, %s1673_s7 }
  0x49   :  { %p1438_p6 = pnand %p1436_p5, %p1433_p4 }
  0x4b   :  { %1441 = shalt.err (!%p1438_p6)
}
  0x4c   :  { %s1442_s30 = scalar_lea.vmem %s76_s23, 1024  ;;  %p1447_p8 = scmp.lt.s32.totalorder %s76_s23, %s76_s23 }
  0x4d   :  { %p1443_p7 = scmp.ne.s32.totalorder %s76_s23, %s1442_s30  ;;  %p1448_p9 = scmp.lt.s32.totalorder %s1442_s30, %s1442_s30 }
  0x4f   :  { %p1449_p10 = por %p1448_p9, %p1447_p8 }
  0x51   :  { %p1450_p11 = pnand %p1449_p10, %p1443_p7 }
  0x53   :  { %1453 = shalt.err (!%p1450_p11)
}
  0x54   :  { %81 = dma.hbm_to_vmem [thread:$0]  %s1673_s7, 1024, %s76_s23, [#allocation9], %s1488_s1, %s1488_s1, %s1489_s10  }
  0x55   :  { %1476 = dma.done.wait [#allocation3], 64  }
  0x56   :  { %1477 = vsyncadd [#allocation3], 4294967232 }
  0x57   :  { %1478 = dma.done.wait [#allocation6], 8960  }
  0x58   :  { %1479 = vsyncadd [#allocation6], 4294958336 }
  0x59   :  { %1480 = dma.done.wait [#allocation9], 3072  }
  0x5a   :  { %1481 = vsyncadd [#allocation9], 4294964224  ;;  %v1493_v0 = vmov 0   ;;  %v1214_v1 = vld [vmem:[#allocation5 + $0x4] ss:$16 sps:$4 sm:$0xff]   ;;  %vm141_vm0 = vcmask 1042432  }
  0x5b   :  { %186 = vmatprep.mubr.bf16.mxu0 %v1493_v0  ;;  %227 = vmatprep.mubr.bf16.mxu1 %v1493_v0  ;;  %v1216_v2 = vld [vmem:[#allocation5 + $0xc] ss:$16 sps:$4 sm:$0xff]   ;;  %v1218_v3 = vld [vmem:[#allocation5] ss:$16 sps:$4 sm:$0xff]   ;;  %v1219_v4 = vld [vmem:[#allocation5 + $0x8] ss:$16 sps:$4 sm:$0xff]  }
  0x5c   :  { %154 = vmatprep.subr.bf16.mxu0 %v1214_v1  ;;  %v105_v5 = vld [vmem:[#allocation5 + $0x20] sm:$0x77]  ;;  %195 = vmatprep.subr.bf16.mxu1 %v1216_v2  ;;  %v106_v7 = vld [vmem:[#allocation5 + $0x28] sm:$0x77]  ;;  %v100_v15 = vld [vmem:[#allocation2] sm:$0xf] }
  0x5d   :  { %v1053_v6 = vcombine.high %v105_v5, %v105_v5  ;;  %v1052_v8 = vcombine.low %v105_v5, %v105_v5  ;;  %155 = vmatpush1.bf16.msra.mxu0 %v1218_v3  ;;  %196 = vmatpush1.bf16.msra.mxu1 %v1219_v4  ;;  %v1055_v9 = vcombine.high %v106_v7, %v106_v7  ;;  %v1226_v12 = vld [vmem:[#allocation7 + $0x4] ss:$16 sps:$4 sm:$0xff]   ;;  %v1229_v14 = vld [vmem:[#allocation7 + $0xc] ss:$16 sps:$4 sm:$0xff]   ;;  %v1224_v16 = vld [vmem:[#allocation7] ss:$16 sps:$4 sm:$0xff]  }
  0x5e   :  { %v1054_v10 = vcombine.low %v106_v7, %v106_v7  ;;  %vm137_vm1 = vcmask 179200   ;;  %v1227_v17 = vld [vmem:[#allocation7 + $0x8] ss:$16 sps:$4 sm:$0xff]   ;;  %v1232_v18 = vld [vmem:[#allocation7 + $0x24] ss:$16 sps:$4 sm:$0xff]   ;;  %vm1495_vm2 = vmmov 0  }
  0x5f   :  { %1056 = vmatprep.subr.msk.bf16.mxu0 %vm141_vm0, %v1053_v6  ;;  %v143_v11 = vsel %vm141_vm0, %v1052_v8, 0  ;;  %1058 = vmatprep.subr.msk.bf16.mxu1 %vm141_vm0, %v1055_v9  ;;  %v1235_v19 = vld [vmem:[#allocation7 + $0x2c] ss:$16 sps:$4 sm:$0xff]   ;;  %v1230_v20 = vld [vmem:[#allocation7 + $0x20] ss:$16 sps:$4 sm:$0xff]   ;;  %s1496_s12 = smov [#allocation11]  }
  0x60   :  { %v149_v13 = vsel %vm141_vm0, %v1054_v10, 0  ;;  %v1233_v21 = vld [vmem:[#allocation7 + $0x28] ss:$16 sps:$4 sm:$0xff]   ;;  %v1238_v22 = vld [vmem:[#allocation7 + $0x44] ss:$16 sps:$4 sm:$0xff]   ;;  %s1037_s13 = sshll.u32 %s1496_s12, 4  ;;  %s1038_s13 = int_to_ptr.vmem [resolvable:$true] %s1037_s13 }
  0x61   :  { %157 = vmatpush1.bf16.msra.mxu0 %v143_v11  ;;  %198 = vmatpush1.bf16.msra.mxu1 %v149_v13  ;;  %v1241_v23 = vld [vmem:[#allocation7 + $0x4c] ss:$16 sps:$4 sm:$0xff]   ;;  %v1236_v24 = vld [vmem:[#allocation7 + $0x40] ss:$16 sps:$4 sm:$0xff]   ;;  %v1239_v25 = vld [vmem:[#allocation7 + $0x48] ss:$16 sps:$4 sm:$0xff]   ;;  %p1459_p13 = scmp.lt.s32.totalorder %s1038_s13, %s1038_s13 }
  0x62   :  { %640 = vmatprep.subr.bf16.mxu0 %v1226_v12  ;;  %681 = vmatprep.subr.bf16.mxu1 %v1229_v14  ;;  %v1244_v26 = vld [vmem:[#allocation7 + $0x64] ss:$16 sps:$4 sm:$0xff]   ;;  %v1247_v27 = vld [vmem:[#allocation7 + $0x6c] ss:$16 sps:$4 sm:$0xff]   ;;  %v1242_v28 = vld [vmem:[#allocation7 + $0x60] ss:$16 sps:$4 sm:$0xff]  }
  0x63   :  { %v1245_v29 = vld [vmem:[#allocation7 + $0x68] ss:$16 sps:$4 sm:$0xff]   ;;  %v1250_v30 = vld [vmem:[#allocation7 + $0x84] ss:$16 sps:$4 sm:$0xff]   ;;  %v1253_v31 = vld [vmem:[#allocation7 + $0x8c] ss:$16 sps:$4 sm:$0xff]  }
  0x64   :  { %1057 = vmatmul.mubr.msk.bf16.vlgmr.msra.gmra.mrb[0].mxu0 %vm137_vm1, %v100_v15  ;;  %1059 = vmatmul.mubr.msk.bf16.vlgmr.msra.gmra.mrb[0].mxu1 %vm137_vm1, %v100_v15  ;;  %v1248_v32 = vld [vmem:[#allocation7 + $0x80] ss:$16 sps:$4 sm:$0xff]   ;;  %v1251_v33 = vld [vmem:[#allocation7 + $0x88] ss:$16 sps:$4 sm:$0xff]   ;;  %v1256_v34 = vld [vmem:[#allocation7 + $0xa4] ss:$16 sps:$4 sm:$0xff]   ;;  %v240_v15 = vlaneseq }
  0x65   :  { %641 = vmatpush1.bf16.msra.mxu0 %v1224_v16  ;;  %682 = vmatpush1.bf16.msra.mxu1 %v1227_v17  ;;  %v1259_v35 = vld [vmem:[#allocation7 + $0xac] ss:$16 sps:$4 sm:$0xff]   ;;  %v1254_v36 = vld [vmem:[#allocation7 + $0xa0] ss:$16 sps:$4 sm:$0xff]   ;;  %v1257_v37 = vld [vmem:[#allocation7 + $0xa8] ss:$16 sps:$4 sm:$0xff]  }
  0x66   :  { %642 = vmatprep.subr.bf16.mxu0 %v1232_v18  ;;  %683 = vmatprep.subr.bf16.mxu1 %v1235_v19  ;;  %v1262_v38 = vld [vmem:[#allocation7 + $0xc4] ss:$16 sps:$4 sm:$0xff]   ;;  %v1265_v39 = vld [vmem:[#allocation7 + $0xcc] ss:$16 sps:$4 sm:$0xff]   ;;  %v1260_v40 = vld [vmem:[#allocation7 + $0xc0] ss:$16 sps:$4 sm:$0xff]  }
  0x67   :  { %v1263_v41 = vld [vmem:[#allocation7 + $0xc8] ss:$16 sps:$4 sm:$0xff]   ;;  %v1268_v42 = vld [vmem:[#allocation7 + $0xe4] ss:$16 sps:$4 sm:$0xff]   ;;  %v1271_v43 = vld [vmem:[#allocation7 + $0xec] ss:$16 sps:$4 sm:$0xff]  }
  0x68   :  { %v1266_v44 = vld [vmem:[#allocation7 + $0xe0] ss:$16 sps:$4 sm:$0xff]   ;;  %v1269_v45 = vld [vmem:[#allocation7 + $0xe8] ss:$16 sps:$4 sm:$0xff]   ;;  %v1274_v46 = vld [vmem:[#allocation7 + $0x104] ss:$16 sps:$4 sm:$0xff]  }
  0x69   :  { %643 = vmatpush1.bf16.msra.mxu0 %v1230_v20  ;;  %684 = vmatpush1.bf16.msra.mxu1 %v1233_v21  ;;  %v1277_v47 = vld [vmem:[#allocation7 + $0x10c] ss:$16 sps:$4 sm:$0xff]   ;;  %v1272_v48 = vld [vmem:[#allocation7 + $0x100] ss:$16 sps:$4 sm:$0xff]   ;;  %v1275_v49 = vld [vmem:[#allocation7 + $0x108] ss:$16 sps:$4 sm:$0xff]  }
  0x6a   :  { %644 = vmatprep.subr.bf16.mxu0 %v1238_v22  ;;  %685 = vmatprep.subr.bf16.mxu1 %v1241_v23  ;;  %v1280_v50 = vld [vmem:[#allocation7 + $0x124] ss:$16 sps:$4 sm:$0xff]   ;;  %v1283_v51 = vld [vmem:[#allocation7 + $0x12c] ss:$16 sps:$4 sm:$0xff]   ;;  %v1278_v52 = vld [vmem:[#allocation7 + $0x120] ss:$16 sps:$4 sm:$0xff]  }
  0x6b   :  { %v1281_v53 = vld [vmem:[#allocation7 + $0x128] ss:$16 sps:$4 sm:$0xff]   ;;  %v1286_v54 = vld [vmem:[#allocation7 + $0x144] ss:$16 sps:$4 sm:$0xff]   ;;  %v1289_v55 = vld [vmem:[#allocation7 + $0x14c] ss:$16 sps:$4 sm:$0xff]  }
  0x6c   :  { %v1284_v56 = vld [vmem:[#allocation7 + $0x140] ss:$16 sps:$4 sm:$0xff]   ;;  %v1287_v57 = vld [vmem:[#allocation7 + $0x148] ss:$16 sps:$4 sm:$0xff]   ;;  %v1292_v58 = vld [vmem:[#allocation7 + $0x164] ss:$16 sps:$4 sm:$0xff]  }
  0x6d   :  { %645 = vmatpush1.bf16.msra.mxu0 %v1236_v24  ;;  %686 = vmatpush1.bf16.msra.mxu1 %v1239_v25  ;;  %v1295_v59 = vld [vmem:[#allocation7 + $0x16c] ss:$16 sps:$4 sm:$0xff]   ;;  %v1290_v60 = vld [vmem:[#allocation7 + $0x160] ss:$16 sps:$4 sm:$0xff]   ;;  %v1293_v61 = vld [vmem:[#allocation7 + $0x168] ss:$16 sps:$4 sm:$0xff]  }
  0x6e   :  { %646 = vmatprep.subr.bf16.mxu0 %v1244_v26  ;;  %687 = vmatprep.subr.bf16.mxu1 %v1247_v27  ;;  %v1298_v62 = vld [vmem:[#allocation7 + $0x184] ss:$16 sps:$4 sm:$0xff]   ;;  %v1301_v63 = vld [vmem:[#allocation7 + $0x18c] ss:$16 sps:$4 sm:$0xff]   ;;  %v1296_v0 = vld [vmem:[#allocation7 + $0x180] ss:$16 sps:$4 sm:$0xff]  }
  0x6f   :  { %v1299_v1 = vld [vmem:[#allocation7 + $0x188] ss:$16 sps:$4 sm:$0xff]   ;;  %v1304_v2 = vld [vmem:[#allocation7 + $0x1a4] ss:$16 sps:$4 sm:$0xff]   ;;  %v1307_v3 = vld [vmem:[#allocation7 + $0x1ac] ss:$16 sps:$4 sm:$0xff]  }
  0x70   :  { %v1302_v4 = vld [vmem:[#allocation7 + $0x1a0] ss:$16 sps:$4 sm:$0xff]   ;;  %v1305_v5 = vld [vmem:[#allocation7 + $0x1a8] ss:$16 sps:$4 sm:$0xff]   ;;  %v1310_v6 = vld [vmem:[#allocation7 + $0x1c4] ss:$16 sps:$4 sm:$0xff]  }
  0x71   :  { %647 = vmatpush1.bf16.msra.mxu0 %v1242_v28  ;;  %688 = vmatpush1.bf16.msra.mxu1 %v1245_v29  ;;  %v1313_v7 = vld [vmem:[#allocation7 + $0x1cc] ss:$16 sps:$4 sm:$0xff]   ;;  %v1308_v8 = vld [vmem:[#allocation7 + $0x1c0] ss:$16 sps:$4 sm:$0xff]   ;;  %v1311_v9 = vld [vmem:[#allocation7 + $0x1c8] ss:$16 sps:$4 sm:$0xff]  }
  0x72   :  { %648 = vmatprep.subr.bf16.mxu0 %v1250_v30  ;;  %689 = vmatprep.subr.bf16.mxu1 %v1253_v31  ;;  %v1316_v10 = vld [vmem:[#allocation7 + $0x1e4] ss:$16 sps:$4 sm:$0xff]   ;;  %v1319_v11 = vld [vmem:[#allocation7 + $0x1ec] ss:$16 sps:$4 sm:$0xff]   ;;  %v1314_v12 = vld [vmem:[#allocation7 + $0x1e0] ss:$16 sps:$4 sm:$0xff]  }
  0x73   :  { %v1317_v13 = vld [vmem:[#allocation7 + $0x1e8] ss:$16 sps:$4 sm:$0xff]   ;;  %v1320_v14 = vld [vmem:[#allocation8 + $0x40] sm:$0xff]   ;;  %v1630_v16 = vshrl.u32 %v240_v15, 7  ;;  %v238_v18 = vld [vmem:[%s1668_s2] sm:$0x3] }
  0x74   :  { %v1342_v15 = vld [vmem:[#allocation10 + $0x30] sm:$0xff]  }
  0x75   :  { %649 = vmatpush1.bf16.msra.mxu0 %v1248_v32  ;;  %690 = vmatpush1.bf16.msra.mxu1 %v1251_v33  ;;  %v242_v17 = vsub.s32 0, %v1630_v16  ;;  %v246_v19 = vsub.s32 1, %v1630_v16  ;;  %v1343_v16 = vld [vmem:[#allocation10 + $0x38] sm:$0xff]  }
  0x76   :  { %650 = vmatprep.subr.bf16.mxu0 %v1256_v34  ;;  %691 = vmatprep.subr.bf16.mxu1 %v1259_v35 }
  0x77   :  { %v243_v20 = vrot.slane %v238_v18, %v242_v17  ;;  %v247_v23 = vrot.slane %v238_v18, %v246_v19  ;;  %v1124_v18 = vld [vmem:[%s1672_s6] ss:$0 sm:$0xff]  ;;  %s1454_s6 = scalar_lea.vmem %s1038_s13, 128 }
  0x78   :  { %p1455_p12 = scmp.ne.s32.totalorder %s1038_s13, %s1454_s6  ;;  %p1460_p0 = scmp.lt.s32.totalorder %s1454_s6, %s1454_s6 }
  0x79   :  { %651 = vmatpush1.bf16.msra.mxu0 %v1254_v36  ;;  %692 = vmatpush1.bf16.msra.mxu1 %v1257_v37  ;;  %v1321_v37 = vld [vmem:[#allocation8] sm:$0xff]  }
  0x7a   :  { %652 = vmatprep.subr.bf16.mxu0 %v1262_v38  ;;  %693 = vmatprep.subr.bf16.mxu1 %v1265_v39  ;;  %v1322_v39 = vld [vmem:[#allocation8 + $0x48] sm:$0xff]   ;;  %p1461_p1 = por %p1460_p0, %p1459_p13 }
  0x7c   :  { %p1462_p2 = pnand %p1461_p1, %p1455_p12 }
  0x7d   :  { %653 = vmatpush1.bf16.msra.mxu0 %v1260_v40  ;;  %694 = vmatpush1.bf16.msra.mxu1 %v1263_v41  ;;  %v1323_v40 = vld [vmem:[#allocation8 + $0x8] sm:$0xff]   ;;  %v1324_v41 = vld [vmem:[#allocation8 + $0x50] sm:$0xff]  }
  0x7e   :  { %654 = vmatprep.subr.bf16.mxu0 %v1268_v42  ;;  %695 = vmatprep.subr.bf16.mxu1 %v1271_v43  ;;  %v1325_v42 = vld [vmem:[#allocation8 + $0x10] sm:$0xff]   ;;  %v1326_v43 = vld [vmem:[#allocation8 + $0x58] sm:$0xff]  }
  0x81   :  { %655 = vmatpush1.bf16.msra.mxu0 %v1266_v44  ;;  %696 = vmatpush1.bf16.msra.mxu1 %v1269_v45  ;;  %v1327_v44 = vld [vmem:[#allocation8 + $0x18] sm:$0xff]   ;;  %v1328_v45 = vld [vmem:[#allocation8 + $0x60] sm:$0xff]  }
  0x82   :  { %656 = vmatprep.subr.bf16.mxu0 %v1274_v46  ;;  %697 = vmatprep.subr.bf16.mxu1 %v1277_v47  ;;  %v1329_v46 = vld [vmem:[#allocation8 + $0x20] sm:$0xff]   ;;  %v1330_v47 = vld [vmem:[#allocation8 + $0x68] sm:$0xff]  }
  0x85   :  { %657 = vmatpush1.bf16.msra.mxu0 %v1272_v48  ;;  %698 = vmatpush1.bf16.msra.mxu1 %v1275_v49  ;;  %v1331_v48 = vld [vmem:[#allocation8 + $0x28] sm:$0xff]   ;;  %v1332_v49 = vld [vmem:[#allocation8 + $0x70] sm:$0xff]  }
  0x86   :  { %658 = vmatprep.subr.bf16.mxu0 %v1280_v50  ;;  %699 = vmatprep.subr.bf16.mxu1 %v1283_v51  ;;  %v1333_v50 = vld [vmem:[#allocation8 + $0x30] sm:$0xff]   ;;  %v1334_v51 = vld [vmem:[#allocation8 + $0x78] sm:$0xff]  }
  0x89   :  { %659 = vmatpush1.bf16.msra.mxu0 %v1278_v52  ;;  %700 = vmatpush1.bf16.msra.mxu1 %v1281_v53  ;;  %v1335_v52 = vld [vmem:[#allocation8 + $0x38] sm:$0xff]   ;;  %v1336_v53 = vld [vmem:[#allocation10] sm:$0xff]  }
  0x8a   :  { %660 = vmatprep.subr.bf16.mxu0 %v1286_v54  ;;  %701 = vmatprep.subr.bf16.mxu1 %v1289_v55  ;;  %v1494_v54 = vmov 0.0   ;;  %v1337_v55 = vld [vmem:[#allocation10 + $0x8] sm:$0xff]  }
  0x8d   :  { %661 = vmatpush1.bf16.msra.mxu0 %v1284_v56  ;;  %702 = vmatpush1.bf16.msra.mxu1 %v1287_v57  ;;  %v1338_v56 = vld [vmem:[#allocation10 + $0x10] sm:$0xff]   ;;  %v1339_v57 = vld [vmem:[#allocation10 + $0x18] sm:$0xff]  }
  0x8e   :  { %662 = vmatprep.subr.bf16.mxu0 %v1292_v58  ;;  %703 = vmatprep.subr.bf16.mxu1 %v1295_v59  ;;  %v1340_v58 = vld [vmem:[#allocation10 + $0x20] sm:$0xff]   ;;  %v1341_v59 = vld [vmem:[#allocation10 + $0x28] sm:$0xff]  }
  0x91   :  { %663 = vmatpush1.bf16.msra.mxu0 %v1290_v60  ;;  %704 = vmatpush1.bf16.msra.mxu1 %v1293_v61  ;;  %v724_v60 = vld [vmem:[%s1670_s4] sm:$0x3] }
  0x92   :  { %664 = vmatprep.subr.bf16.mxu0 %v1298_v62  ;;  %705 = vmatprep.subr.bf16.mxu1 %v1301_v63  ;;  %v729_v61 = vrot.slane %v724_v60, %v242_v17 }
  0x95   :  { %665 = vmatpush1.bf16.msra.mxu0 %v1296_v0  ;;  %706 = vmatpush1.bf16.msra.mxu1 %v1299_v1  ;;  %v733_v0 = vrot.slane %v724_v60, %v246_v19 }
  0x96   :  { %666 = vmatprep.subr.bf16.mxu0 %v1304_v2  ;;  %707 = vmatprep.subr.bf16.mxu1 %v1307_v3 }
  0x99   :  { %667 = vmatpush1.bf16.msra.mxu0 %v1302_v4  ;;  %708 = vmatpush1.bf16.msra.mxu1 %v1305_v5 }
  0x9a   :  { %668 = vmatprep.subr.bf16.mxu0 %v1310_v6  ;;  %709 = vmatprep.subr.bf16.mxu1 %v1313_v7 }
  0x9d   :  { %669 = vmatpush1.bf16.msra.mxu0 %v1308_v8  ;;  %710 = vmatpush1.bf16.msra.mxu1 %v1311_v9 }
  0x9e   :  { %670 = vmatprep.subr.bf16.mxu0 %v1316_v10  ;;  %711 = vmatprep.subr.bf16.mxu1 %v1319_v11 }
  0xa1   :  { %671 = vmatpush1.bf16.msra.mxu0 %v1314_v12  ;;  %712 = vmatpush1.bf16.msra.mxu1 %v1317_v13 }
  0xa2   :  { %1150 = vmatprep.subr.bf16.mxu0 %v1320_v14  ;;  %1181 = vmatprep.subr.bf16.mxu1 %v1494_v54 }
 0x137   :  { %v188_v21 = vpop.f32.mrb[0].mxu0  ;;  %v229_v22 = vpop.f32.mrb[0].mxu1 }
 0x138   :  { %v236_v24 = vmax.f32 %v188_v21, %v229_v22  ;;  %v190_v25 = vpop.f32.mrb[1].mxu0  ;;  %v231_v26 = vpop.f32.mrb[1].mxu1 }
 0x139   :  { %v237_v27 = vmax.f32 %v190_v25, %v231_v26  ;;  %v192_v28 = vpop.f32.mrb[2].mxu0  ;;  %v233_v29 = vpop.f32.mrb[2].mxu1  ;;  %v1141_v26 = vld [vmem:[%s1674_s8] ss:$0 sm:$0xff] }
 0x13a   :  { %v250_v30 = vadd.f32 %v243_v20, %v236_v24  ;;  %v193_v31 = vpop.f32.mrb[3].mxu0  ;;  %v234_v32 = vpop.f32.mrb[3].mxu1 }
 0x13b   :  { %v251_v33 = vadd.f32 %v247_v23, %v237_v27 }
 0x13c   :  { %v252_v34 = vmax.f32 %v250_v30, 0.0 }
 0x13d   :  { %v253_v35 = vmax.f32 %v251_v33, 0.0 }
 0x13e   :  { %v254_v38 = vpack.c.bf16 %v252_v34, %v252_v34 }
 0x13f   :  { %v255_v36 = vpack.c.bf16 %v253_v35, %v253_v35 }
 0x141   :  { %672 = vmatprep.mubr.bf16.mxu0 %v255_v36  ;;  %713 = vmatprep.mubr.bf16.mxu1 %v255_v36 }
 0x142   :  { %673 = vmatmul.mubr.bf16.vlgmr.msra.gmra.mrb[4].mxu0 %v254_v38  ;;  %714 = vmatmul.mubr.bf16.vlgmr.msra.gmra.mrb[4].mxu1 %v254_v38 }
 0x143   :  { %1151 = vmatpush3.bf16.msra.mxu0 %v1321_v37  ;;  %1182 = vmatpush3.bf16.msra.mxu1 %v1336_v53 }
 0x144   :  { %1152 = vmatprep.subr.bf16.mxu0 %v1322_v39  ;;  %1183 = vmatprep.subr.bf16.mxu1 %v1494_v54 }
 0x145   :  { %1197 = vmatprep.mubr.msk.bf16.mxu1 %vm1495_vm2, %v1494_v54 }
 0x147   :  { %1153 = vmatpush3.bf16.msra.mxu0 %v1323_v40  ;;  %1184 = vmatpush3.bf16.msra.mxu1 %v1337_v55 }
 0x148   :  { %1154 = vmatprep.subr.bf16.mxu0 %v1324_v41  ;;  %1185 = vmatprep.subr.bf16.mxu1 %v1494_v54 }
 0x14b   :  { %1155 = vmatpush3.bf16.msra.mxu0 %v1325_v42  ;;  %1186 = vmatpush3.bf16.msra.mxu1 %v1338_v56 }
 0x14c   :  { %1156 = vmatprep.subr.bf16.mxu0 %v1326_v43  ;;  %1187 = vmatprep.subr.bf16.mxu1 %v1494_v54 }
 0x14f   :  { %1157 = vmatpush3.bf16.msra.mxu0 %v1327_v44  ;;  %1188 = vmatpush3.bf16.msra.mxu1 %v1339_v57 }
 0x150   :  { %1158 = vmatprep.subr.bf16.mxu0 %v1328_v45  ;;  %1189 = vmatprep.subr.bf16.mxu1 %v1494_v54 }
 0x153   :  { %1159 = vmatpush3.bf16.msra.mxu0 %v1329_v46  ;;  %1190 = vmatpush3.bf16.msra.mxu1 %v1340_v58 }
 0x154   :  { %1160 = vmatprep.subr.bf16.mxu0 %v1330_v47  ;;  %1191 = vmatprep.subr.bf16.mxu1 %v1494_v54 }
 0x157   :  { %1161 = vmatpush3.bf16.msra.mxu0 %v1331_v48  ;;  %1192 = vmatpush3.bf16.msra.mxu1 %v1341_v59 }
 0x158   :  { %1162 = vmatprep.subr.bf16.mxu0 %v1332_v49  ;;  %1193 = vmatprep.subr.bf16.mxu1 %v1494_v54 }
 0x15b   :  { %1163 = vmatpush3.bf16.msra.mxu0 %v1333_v50  ;;  %1194 = vmatpush3.bf16.msra.mxu1 %v1342_v15 }
 0x15c   :  { %1164 = vmatprep.subr.bf16.mxu0 %v1334_v51  ;;  %1195 = vmatprep.subr.bf16.mxu1 %v1494_v54 }
 0x15f   :  { %1165 = vmatpush3.bf16.msra.mxu0 %v1335_v52  ;;  %1196 = vmatpush3.bf16.msra.mxu1 %v1343_v16 }
 0x215   :  { %v674_v62 = vpop.f32.mrb[4].mxu0  ;;  %v715_v63 = vpop.f32.mrb[4].mxu1 }
 0x216   :  { %v722_v1 = vmax.f32 %v674_v62, %v715_v63  ;;  %v676_v2 = vpop.f32.mrb[5].mxu0  ;;  %v717_v3 = vpop.f32.mrb[5].mxu1 }
 0x217   :  { %v723_v4 = vmax.f32 %v676_v2, %v717_v3  ;;  %v678_v5 = vpop.f32.mrb[6].mxu0  ;;  %v719_v6 = vpop.f32.mrb[6].mxu1 }
 0x218   :  { %v736_v7 = vadd.f32 %v729_v61, %v722_v1  ;;  %v679_v8 = vpop.f32.mrb[7].mxu0  ;;  %v720_v9 = vpop.f32.mrb[7].mxu1 }
 0x219   :  { %v737_v10 = vadd.f32 %v733_v0, %v723_v4 }
 0x21a   :  { %v738_v11 = vmax.f32 %v736_v7, 0.0 }
 0x21b   :  { %v739_v12 = vmax.f32 %v737_v10, 0.0 }
 0x21c   :  { %v740_v14 = vpack.c.bf16 %v738_v11, %v738_v11 }
 0x21d   :  { %v741_v13 = vpack.c.bf16 %v739_v12, %v739_v12 }
 0x21f   :  { %909 = vmatprep.mubr.bf16.mxu0 %v741_v13 }
 0x220   :  { %910 = vmatmul.mubr.bf16.vlgmr.msra.gmra.mrb[8].mxu0 %v740_v14 }
 0x2f3   :  { %v1166_v17 = vpop.f32.mrb[8].mxu0 }
 0x2f4   :  { %v1167_v19 = vpop.f32.mrb[9].mxu0 }
 0x2f5   :  { %v1168_v20 = vadd.f32 %v1167_v19, %v1166_v17  ;;  %v1169_v21 = vpop.f32.mrb[10].mxu0 }
 0x2f6   :  { %v1170_v22 = vpop.f32.mrb[11].mxu0 }
 0x2f7   :  { %v912_v23 = vadd.f32 %v1168_v20, %v1124_v18 }
 0x2f9   :  { %v917_v24 = vmax.f32 %v912_v23, 0.0 }
 0x2fb   :  { %v918_v25 = vpack.c.bf16 %v917_v24, %v917_v24 }
 0x2fd   :  { %1198 = vmatmul.mubr.bf16.vlgmr.msra.gmra.mrb[8].mxu1 %v918_v25 }
 0x3d0   :  { %v1024_v27 = vpop.f32.mrb[8].mxu1 }
 0x3d1   :  { %v1025_v28 = vadd.f32 %v1141_v26, %v1024_v27  ;;  %v1199_v29 = vpop.f32.mrb[9].mxu1 }
 0x3d2   :  { %v1027_v30 = vpop.f32.mrb[10].mxu1 }
 0x3d3   :  { %1030 = vst [vmem:[#allocation11] sm:$0xff] %v1025_v28  ;;  %v1200_v31 = vpop.f32.mrb[11].mxu1 }
 0x3d4   :  { %1465 = shalt.err (!%p1462_p2)
}
 0x3d5   :  { %s1466_s8 = scalar_lea.hbm %s1675_s9, 128 }
 0x3d6   :  { %p1467_p3 = scmp.ne.s32.totalorder %s1675_s9, %s1466_s8  ;;  %p1470_p4 = scmp.lt.u32.totalorder %s1466_s8, %s1675_s9 }
 0x3d8   :  { %p1472_p5 = pnand %p1470_p4, %p1467_p3 }
 0x3da   :  { %1475 = shalt.err (!%p1472_p5)
}
 0x3db   :  { %1040 = dma.vmem_to_hbm [thread:$0]  %s1038_s13, 128, %s1675_s9, [#allocation4]  }
 0x3dc   :  { %1482 = dma.done.wait [#allocation4], 128  }
 0x3dd   :  { %1483 = vsyncadd [#allocation4], 4294967168 }
 0x3de   :  { %1044 = vsyncpa [#allocation3], 1 }
 0x3df   :  { %1045 = vsyncpa [#allocation6], 1 }
 0x3e0   :  { %1046 = vsyncpa [#allocation9], 1 }
 0x3e1   :  { %1047 = vsyncpa [#allocation4], 1 }

</bundles_post_ra>
